<compile_context>
chip_gen: v5e
topology: v5e:2x2
jax: 0.10.0
libtpu: 0.0.40
codegen_flags: <defaults>
</compile_context>

<pallas_src>
import jax
import jax.numpy as jnp
from jax import lax
from jax.experimental import pallas as pl
from jax.experimental.pallas import tpu as pltpu


# ----------------------------------------------------------------------------
# Parameter prep (run ONCE, outside the per-forward path)
# ----------------------------------------------------------------------------
def prepare_attention_params(wq, bq, wk, bk, wv, bv):
    """Fuse K/V projections and fold the 1/sqrt(H) scale into the Q projection.

    wq/wk/wv: (H, H) already transposed to (H_in, H_out); bq/bk/bv: (1, H).
    Returns (wq_scaled, bq_scaled, w_kv, b_kv).
    """
    h = wq.shape[0]
    scale = 1.0 / (float(h) ** 0.5)
    wq_s = wq * scale                      # (H, H)   scaled query weight
    bq_s = bq * scale                      # (1, H)   scaled query bias
    w_kv = jnp.concatenate([wk, wv], axis=1)   # (H, 2H) fused K/V weight
    b_kv = jnp.concatenate([bk, bv], axis=1)   # (1, 2H) fused K/V bias
    return wq_s, bq_s, w_kv, b_kv


# ----------------------------------------------------------------------------
# Kernel 1: fused K/V projection over row tiles of the flattened (B*S, H) input
# ----------------------------------------------------------------------------
def _make_kv_proj_kernel(compute_dtype):
    def kernel(x_ref, w_ref, b_ref, k_ref, v_ref):
        x = x_ref[...].astype(compute_dtype)        # (TM, H)
        w = w_ref[...].astype(compute_dtype)        # (H, 2H)
        kv = jnp.dot(x, w, preferred_element_type=jnp.float32) + b_ref[...]
        h = k_ref.shape[-1]
        k_ref[...] = kv[:, :h].astype(k_ref.dtype)
        v_ref[...] = kv[:, h:].astype(v_ref.dtype)
    return kernel


# ----------------------------------------------------------------------------
# Kernel 2: fused Q projection + scaled dot-product attention
#           for one (batch, query-tile) grid step
# ----------------------------------------------------------------------------
def _make_attention_kernel(compute_dtype):
    def kernel(x_ref, wq_ref, bq_ref, k_ref, v_ref, ctx_ref, attn_ref):
        x = x_ref[0].astype(compute_dtype)          # (TQ, H)
        wq = wq_ref[...].astype(compute_dtype)      # (H, H)  -- already * 1/sqrt(H)
        k = k_ref[0]                                # (S,  H)
        v = v_ref[0]                                # (S,  H)

        # Fused, pre-scaled Q projection (no q HBM round-trip, no per-step scale).
        q = jnp.dot(x, wq, preferred_element_type=jnp.float32) + bq_ref[...]

        # scores[i, j] = sum_d q[i, d] * k[j, d]  -- contract last dims, no k.T.
        scores = lax.dot_general(
            q.astype(compute_dtype), k.astype(compute_dtype),
            dimension_numbers=(((1,), (1,)), ((), ())),
            preferred_element_type=jnp.float32,
        )                                           # (TQ, S), f32

        # Numerically stable softmax over keys.
        m = jnp.max(scores, axis=-1, keepdims=True)
        e = jnp.exp(scores - m)
        denom = jnp.sum(e, axis=-1, keepdims=True)
        # EUP approx reciprocal + one Newton step (denom >= 1, so this is safe and
        # keeps ~f32 accuracy while the VPU slots stay free for the elementwise work).
        r = pl.reciprocal(denom, approx=True)
        r = r * (2.0 - denom * r)
        attn = e * r                                # (TQ, S), f32

        # Context: (TQ, H).
        ctx = jnp.dot(attn.astype(compute_dtype), v.astype(compute_dtype),
                      preferred_element_type=jnp.float32)

        ctx_ref[0] = ctx.astype(ctx_ref.dtype)
        attn_ref[0] = attn.astype(attn_ref.dtype)
    return kernel


# ----------------------------------------------------------------------------
# Wrapper helpers
# ----------------------------------------------------------------------------
def _row_tile(n, max_tile):
    """Largest MXU-friendly tile <= max_tile that divides n; else the full extent."""
    for t in (512, 256, 128):
        if t <= max_tile and n % t == 0:
            return t
    # NOTE: falls back to the full extent for indivisible n; fine for small
    # shapes, but for large indivisible shapes this single block can blow VMEM.
    return n


def _vmem_limit_bytes(block_bytes):
    """Explicit scoped-VMEM limit from the actual block footprint (+50% headroom
    for compiler scratch / layout padding), clamped to [32 MiB, 128 MiB]."""
    need = int(block_bytes * 1.5) + (2 << 20)
    return int(max(32 << 20, min(need, 128 << 20)))


def _spec(shape, index_map, single_buffer):
    """Constant-index / batch-resident blocks don't need a second pipeline buffer."""
    if single_buffer:
        try:
            return pl.BlockSpec(shape, index_map, pipeline_mode=pl.Buffered(1))
        except (TypeError, ValueError):
            pass  # this Pallas build doesn't take pipeline_mode -- use the default
    return pl.BlockSpec(shape, index_map)


# ----------------------------------------------------------------------------
# Forward
# ----------------------------------------------------------------------------
def _attention_forward_impl(x, params, *, single_buffer, use_bf16_matmul, attn_dtype):
    wq_s, bq_s, w_kv, b_kv = params
    B, S, H = x.shape
    BS = B * S
    isz = x.dtype.itemsize
    compute_dtype = jnp.bfloat16 if use_bf16_matmul else x.dtype
    attn_dtype = x.dtype if attn_dtype is None else attn_dtype
    attn_isz = jnp.dtype(attn_dtype).itemsize

    # ---- Phase 1: fused K/V projection over all B*S rows -------------------
    x2 = x.reshape(BS, H)
    TM = _row_tile(BS, max_tile=512)
    n_row_tiles = BS // TM

    p1_vmem = _vmem_limit_bytes(
        2 * TM * H * isz                       # x tile (double-buffered)
        + (1 if single_buffer else 2) * H * 2 * H * w_kv.dtype.itemsize  # fused weight
        + 8 * 2 * H * 4                        # bias (sublane-padded)
        + 2 * 2 * TM * H * isz                 # k, v outputs (double-buffered)
        + TM * 2 * H * 4                       # in-kernel f32 kv intermediate
    )

    kv_out_spec = pl.BlockSpec((TM, H), lambda i: (i, 0))
    k2, v2 = pl.pallas_call(
        _make_kv_proj_kernel(compute_dtype),
        out_shape=(
            jax.ShapeDtypeStruct((BS, H), x.dtype),
            jax.ShapeDtypeStruct((BS, H), x.dtype),
        ),
        grid_spec=pltpu.PrefetchScalarGridSpec(
            num_scalar_prefetch=0,
            grid=(n_row_tiles,),
            in_specs=[
                pl.BlockSpec((TM, H), lambda i: (i, 0)),
                # Constant-index weight/bias: single-buffered (second buffer is waste).
                _spec((H, 2 * H), lambda i: (0, 0), single_buffer),
                _spec((1, 2 * H), lambda i: (0, 0), single_buffer),
            ],
            out_specs=[kv_out_spec, kv_out_spec],
        ),
        compiler_params=pltpu.CompilerParams(
            dimension_semantics=("parallel",),
            vmem_limit_bytes=p1_vmem),
    )(x2, w_kv, b_kv)

    k = k2.reshape(B, S, H)
    v = v2.reshape(B, S, H)

    # ---- Phase 2: fused Q projection + attention, tiled over (batch, q tile) ----
    # TQ = 256 keeps v5e MXU-bound and is a full v6e/v7x MXU tile.
    TQ = _row_tile(S, max_tile=256)
    n_q_tiles = S // TQ
    # TODO(synk): for very long S, add a key-tile grid axis with flash-style online
    # softmax so VMEM stays O(TQ*TK) instead of full-S K/V + a (TQ,S) score block.

    kv_bufs = 1 if single_buffer else 2
    p2_vmem = _vmem_limit_bytes(
        2 * TQ * H * isz                        # x tile (double-buffered)
        + (1 if single_buffer else 2) * H * H * wq_s.dtype.itemsize  # wq (scaled)
        + 8 * H * 4                             # bq (sublane-padded)
        + 2 * kv_bufs * S * H * isz             # full-S K and V blocks
        + 2 * TQ * H * isz                      # ctx output (double-buffered)
        + 2 * TQ * S * attn_isz                 # attn output (double-buffered)
        + 4 * TQ * S * 4                        # in-kernel f32 scores/exp temporaries
    )

    ctx, attn = pl.pallas_call(
        _make_attention_kernel(compute_dtype),
        out_shape=(
            jax.ShapeDtypeStruct((B, S, H), x.dtype),
            jax.ShapeDtypeStruct((B, S, S), attn_dtype),
        ),
        grid_spec=pltpu.PrefetchScalarGridSpec(
            num_scalar_prefetch=0,
            # qi innermost: K/V only re-DMA when b changes (full-S residency).
            grid=(B, n_q_tiles),
            in_specs=[
                pl.BlockSpec((1, TQ, H), lambda b, qi: (b, qi, 0)),   # x tile
                _spec((H, H), lambda b, qi: (0, 0), single_buffer),   # wq (scaled)
                _spec((1, H), lambda b, qi: (0, 0), single_buffer),   # bq (scaled)
                _spec((1, S, H), lambda b, qi: (b, 0, 0), single_buffer),  # full K
                _spec((1, S, H), lambda b, qi: (b, 0, 0), single_buffer),  # full V
            ],
            out_specs=[
                pl.BlockSpec((1, TQ, H), lambda b, qi: (b, qi, 0)),
                pl.BlockSpec((1, TQ, S), lambda b, qi: (b, qi, 0)),
            ],
        ),
        compiler_params=pltpu.CompilerParams(
            dimension_semantics=("parallel", "parallel"),
            vmem_limit_bytes=p2_vmem),
    )(x, wq_s, bq_s, k, v)

    return ctx, attn


def attention_forward(x, params, *, use_bf16_matmul=False, attn_dtype=None):
    """x: (B, S, H); params from prepare_attention_params.

    use_bf16_matmul: cast MXU operands to bf16 (f32 accumulation) -- ~3x matmul
        throughput when tolerance allows; default off to match f32 reference.
    attn_dtype: dtype of the returned (B,S,S) attention weights (narrow to bf16
        on v6e to relieve the HBM-store bound); default x.dtype.
    Returns (context (B,S,H), attention_weights (B,S,S)).
    """
    try:
        return _attention_forward_impl(
            x, params, single_buffer=True,
            use_bf16_matmul=use_bf16_matmul, attn_dtype=attn_dtype)
    except Exception:
        # Fallback for Pallas builds that reject Buffered(1) at lowering time.
        return _attention_forward_impl(
            x, params, single_buffer=False,
            use_bf16_matmul=use_bf16_matmul, attn_dtype=attn_dtype)


# ----------------------------------------------------------------------------
# Pure-JAX reference
# ----------------------------------------------------------------------------
def reference_attention(x, wq, bq, wk, bk, wv, bv):
    q = jnp.einsum("bsh,hd->bsd", x, wq) + bq
    k = jnp.einsum("bsh,hd->bsd", x, wk) + bk
    v = jnp.einsum("bsh,hd->bsd", x, wv) + bv
    scores = jnp.einsum("bqd,bkd->bqk", q, k) / (x.shape[-1] ** 0.5)
    attn = jax.nn.softmax(scores, axis=-1)
    ctx = jnp.einsum("bqk,bkd->bqd", attn, v)
    return ctx, attn


if __name__ == "__main__":
    B, S, H = 2, 8, 32
    key = jax.random.PRNGKey(0)
    kx, kq, kbq, kk, kbk, kv_, kbv = jax.random.split(key, 7)

    x = jax.random.normal(kx, (B, S, H), dtype=jnp.float32)

    # Deterministic parameter init (mimics nn.Linear uniform(-1/sqrt(H), 1/sqrt(H))).
    bound = 1.0 / (H ** 0.5)
    # Stored already transposed: (H_in, H_out)
    wq = jax.random.uniform(kq, (H, H), jnp.float32, -bound, bound)
    wk = jax.random.uniform(kk, (H, H), jnp.float32, -bound, bound)
    wv = jax.random.uniform(kv_, (H, H), jnp.float32, -bound, bound)
    bq = jax.random.uniform(kbq, (1, H), jnp.float32, -bound, bound)
    bk = jax.random.uniform(kbk, (1, H), jnp.float32, -bound, bound)
    bv = jax.random.uniform(kbv, (1, H), jnp.float32, -bound, bound)

    params = prepare_attention_params(wq, bq, wk, bk, wv, bv)  # hoisted, once

    ctx, attn = attention_forward(x, params)
    ctx = jax.block_until_ready(ctx)
    attn = jax.block_until_ready(attn)

    ctx_ref, attn_ref = reference_attention(x, wq, bq, wk, bk, wv, bv)
    assert jnp.allclose(ctx, ctx_ref, atol=1e-4, rtol=1e-4)
    assert jnp.allclose(attn, attn_ref, atol=1e-4, rtol=1e-4)

    print("KERNEL_OK")
</pallas_src>

<mosaic_0001>
module attributes {stable_mosaic.version = 11 : i64} {
  func.func @kernel(%arg0: i32, %arg1: memref<16x32xf32, #tpu.memory_space<vmem>>, %arg2: memref<32x64xf32, #tpu.memory_space<vmem>>, %arg3: memref<1x64xf32, #tpu.memory_space<vmem>>, %arg4: memref<16x32xf32, #tpu.memory_space<vmem>>, %arg5: memref<16x32xf32, #tpu.memory_space<vmem>>) attributes {dimension_semantics = [#tpu.dimension_semantics<parallel>], iteration_bounds = array<i64: 1>, scalar_prefetch = 0 : i64, scratch_operands = 0 : i64, tpu.core_type = #tpu.core_type<tc>, window_params = [{transform_indices = @transform_0, window_bounds = array<i64: 16, 32>}, {pipeline_mode = #tpu.pipeline_mode<synchronous>, transform_indices = @transform_1, window_bounds = array<i64: 32, 64>}, {pipeline_mode = #tpu.pipeline_mode<synchronous>, transform_indices = @transform_2, window_bounds = array<i64: 1, 64>}, {transform_indices = @transform_3, window_bounds = array<i64: 16, 32>}, {transform_indices = @transform_4, window_bounds = array<i64: 16, 32>}]} {
    %c0 = arith.constant 0 : index
    %c0_0 = arith.constant 0 : index
    %0 = vector.load %arg1[%c0, %c0_0] : memref<16x32xf32, #tpu.memory_space<vmem>>, vector<16x32xf32>
    %c0_1 = arith.constant 0 : index
    %c0_2 = arith.constant 0 : index
    %1 = vector.load %arg2[%c0_1, %c0_2] : memref<32x64xf32, #tpu.memory_space<vmem>>, vector<32x64xf32>
    %cst = arith.constant dense<0.000000e+00> : vector<16x64xf32>
    %2 = tpu.matmul %0, %1, %cst {dimension_numbers = #tpu.dot_dimension_numbers<[1], [0], [0], [1], [0, 0, 1, 1], [], []>} : vector<16x32xf32>, vector<32x64xf32>, vector<16x64xf32> -> vector<16x64xf32>
    %c0_3 = arith.constant 0 : index
    %c0_4 = arith.constant 0 : index
    %3 = vector.load %arg3[%c0_3, %c0_4] : memref<1x64xf32, #tpu.memory_space<vmem>>, vector<1x64xf32>
    %4 = vector.broadcast %3 : vector<1x64xf32> to vector<16x64xf32>
    %5 = arith.addf %2, %4 : vector<16x64xf32>
    %6 = vector.extract_strided_slice %5 {offsets = [0, 0], sizes = [16, 32], strides = [1, 1]} : vector<16x64xf32> to vector<16x32xf32>
    %c0_5 = arith.constant 0 : index
    %c0_6 = arith.constant 0 : index
    %7 = vector.load %arg4[%c0_5, %c0_6] : memref<16x32xf32, #tpu.memory_space<vmem>>, vector<16x32xf32>
    tpu.vector_store %arg4[%c0_5, %c0_6], %6 {strides = array<i32>} : memref<16x32xf32, #tpu.memory_space<vmem>>, vector<16x32xf32>,
    %8 = vector.extract_strided_slice %5 {offsets = [0, 32], sizes = [16, 32], strides = [1, 1]} : vector<16x64xf32> to vector<16x32xf32>
    %c0_7 = arith.constant 0 : index
    %c0_8 = arith.constant 0 : index
    %9 = vector.load %arg5[%c0_7, %c0_8] : memref<16x32xf32, #tpu.memory_space<vmem>>, vector<16x32xf32>
    tpu.vector_store %arg5[%c0_7, %c0_8], %8 {strides = array<i32>} : memref<16x32xf32, #tpu.memory_space<vmem>>, vector<16x32xf32>,
    return
  }
  func.func @transform_0(%arg0: i32) -> (i32, i32) {
    %c0_i32 = arith.constant 0 : i32
    %c0_i32_0 = arith.constant 0 : i32
    return %arg0, %c0_i32 : i32, i32
  }
  func.func @transform_1(%arg0: i32) -> (i32, i32) {
    %c0_i32 = arith.constant 0 : i32
    %c0_i32_0 = arith.constant 0 : i32
    %c0_i32_1 = arith.constant 0 : i32
    return %c0_i32, %c0_i32_0 : i32, i32
  }
  func.func @transform_2(%arg0: i32) -> (i32, i32) {
    %c0_i32 = arith.constant 0 : i32
    %c0_i32_0 = arith.constant 0 : i32
    %c0_i32_1 = arith.constant 0 : i32
    return %c0_i32, %c0_i32_0 : i32, i32
  }
  func.func @transform_3(%arg0: i32) -> (i32, i32) {
    %c0_i32 = arith.constant 0 : i32
    %c0_i32_0 = arith.constant 0 : i32
    return %arg0, %c0_i32 : i32, i32
  }
  func.func @transform_4(%arg0: i32) -> (i32, i32) {
    %c0_i32 = arith.constant 0 : i32
    %c0_i32_0 = arith.constant 0 : i32
    return %arg0, %c0_i32 : i32, i32
  }
}

module attributes {stable_mosaic.version = 11 : i64} {
  func.func @kernel(%arg0: i32, %arg1: memref<16x32xf32, #tpu.memory_space<vmem>>, %arg2: memref<32x64xf32, #tpu.memory_space<vmem>>, %arg3: memref<1x64xf32, #tpu.memory_space<vmem>>, %arg4: memref<16x32xf32, #tpu.memory_space<vmem>>, %arg5: memref<16x32xf32, #tpu.memory_space<vmem>>) attributes {dimension_semantics = [#tpu.dimension_semantics<parallel>], iteration_bounds = array<i64: 1>, scalar_prefetch = 0 : i64, scratch_operands = 0 : i64, tpu.core_type = #tpu.core_type<tc>, window_params = [{transform_indices = @transform_0, window_bounds = array<i64: 16, 32>}, {pipeline_mode = #tpu.pipeline_mode<synchronous>, transform_indices = @transform_1, window_bounds = array<i64: 32, 64>}, {pipeline_mode = #tpu.pipeline_mode<synchronous>, transform_indices = @transform_2, window_bounds = array<i64: 1, 64>}, {transform_indices = @transform_3, window_bounds = array<i64: 16, 32>}, {transform_indices = @transform_4, window_bounds = array<i64: 16, 32>}]} {
    %c0 = arith.constant 0 : index
    %c0_0 = arith.constant 0 : index
    %0 = vector.load %arg1[%c0, %c0_0] : memref<16x32xf32, #tpu.memory_space<vmem>>, vector<16x32xf32>
    %c0_1 = arith.constant 0 : index
    %c0_2 = arith.constant 0 : index
    %1 = vector.load %arg2[%c0_1, %c0_2] : memref<32x64xf32, #tpu.memory_space<vmem>>, vector<32x64xf32>
    %cst = arith.constant dense<0.000000e+00> : vector<16x64xf32>
    %2 = tpu.matmul %0, %1, %cst {dimension_numbers = #tpu.dot_dimension_numbers<[1], [0], [0], [1], [0, 0, 1, 1], [], []>} : vector<16x32xf32>, vector<32x64xf32>, vector<16x64xf32> -> vector<16x64xf32>
    %c0_3 = arith.constant 0 : index
    %c0_4 = arith.constant 0 : index
    %3 = vector.load %arg3[%c0_3, %c0_4] : memref<1x64xf32, #tpu.memory_space<vmem>>, vector<1x64xf32>
    %4 = vector.broadcast %3 : vector<1x64xf32> to vector<16x64xf32>
    %5 = arith.addf %2, %4 : vector<16x64xf32>
    %6 = vector.extract_strided_slice %5 {offsets = [0, 0], sizes = [16, 32], strides = [1, 1]} : vector<16x64xf32> to vector<16x32xf32>
    %c0_5 = arith.constant 0 : index
    %c0_6 = arith.constant 0 : index
    %7 = vector.load %arg4[%c0_5, %c0_6] : memref<16x32xf32, #tpu.memory_space<vmem>>, vector<16x32xf32>
    tpu.vector_store %arg4[%c0_5, %c0_6], %6 {strides = array<i32>} : memref<16x32xf32, #tpu.memory_space<vmem>>, vector<16x32xf32>,
    %8 = vector.extract_strided_slice %5 {offsets = [0, 32], sizes = [16, 32], strides = [1, 1]} : vector<16x64xf32> to vector<16x32xf32>
    %c0_7 = arith.constant 0 : index
    %c0_8 = arith.constant 0 : index
    %9 = vector.load %arg5[%c0_7, %c0_8] : memref<16x32xf32, #tpu.memory_space<vmem>>, vector<16x32xf32>
    tpu.vector_store %arg5[%c0_7, %c0_8], %8 {strides = array<i32>} : memref<16x32xf32, #tpu.memory_space<vmem>>, vector<16x32xf32>,
    return
  }
  func.func @transform_0(%arg0: i32) -> (i32, i32) {
    %c0_i32 = arith.constant 0 : i32
    %c0_i32_0 = arith.constant 0 : i32
    return %arg0, %c0_i32 : i32, i32
  }
  func.func @transform_1(%arg0: i32) -> (i32, i32) {
    %c0_i32 = arith.constant 0 : i32
    %c0_i32_0 = arith.constant 0 : i32
    %c0_i32_1 = arith.constant 0 : i32
    return %c0_i32, %c0_i32_0 : i32, i32
  }
  func.func @transform_2(%arg0: i32) -> (i32, i32) {
    %c0_i32 = arith.constant 0 : i32
    %c0_i32_0 = arith.constant 0 : i32
    %c0_i32_1 = arith.constant 0 : i32
    return %c0_i32, %c0_i32_0 : i32, i32
  }
  func.func @transform_3(%arg0: i32) -> (i32, i32) {
    %c0_i32 = arith.constant 0 : i32
    %c0_i32_0 = arith.constant 0 : i32
    return %arg0, %c0_i32 : i32, i32
  }
  func.func @transform_4(%arg0: i32) -> (i32, i32) {
    %c0_i32 = arith.constant 0 : i32
    %c0_i32_0 = arith.constant 0 : i32
    return %arg0, %c0_i32 : i32, i32
  }
}

</mosaic_0001>

<bundles_post_ra>
// kernel: tpu_custom_call.1
= control target key start
LH: loop header
LB: loop body
LE: loop exit
PB: predicated region body
PF: predicated region fallthrough
CT: control target
= control target key end

     0   :  { %10 = vsyncpa [#allocation3], 0  ;;  %s323_s0 = inlined_call_operand.hbm [shape: f32[16,32], index: 0, kind: input, shape index: {}]   ;;  %s324_s1 = inlined_call_operand.hbm [shape: f32[32,64], index: 1, kind: input, shape index: {}]   ;;  %s325_s2 = inlined_call_operand.vmem [shape: f32[1,64], index: 2, kind: input, shape index: {}]   ;;  %s326_s3 = inlined_call_operand.hbm [shape: f32[16,32], index: 3, kind: output, shape index: {0}]   ;;  %s327_s4 = inlined_call_operand.hbm [shape: f32[16,32], index: 4, kind: output, shape index: {1}]  }
   0x1   :  { %11 = vsyncpa [#allocation6], 0 }
   0x2   :  { %12 = vsyncpa [#allocation4], 0 }
   0x3   :  { %13 = vsyncpa [#allocation9], 0  ;;  %s18_s17 = sshll.u32 %s323_s0, 4  ;;  %s258_s18 = smov [#allocation2]   ;;  %s19_s17 = int_to_ptr.hbm [resolvable:$true] %s18_s17 }
   0x4   :  { %s20_s19 = sshll.u32 %s258_s18, 4  ;;  %s31_s22 = sshll.u32 %s324_s1, 4  ;;  %s21_s19 = int_to_ptr.vmem [resolvable:$true] %s20_s19  ;;  %s32_s22 = int_to_ptr.hbm [resolvable:$true] %s31_s22 }
   0x5   :  { %s259_s23 = smov 128   ;;  %s260_s24 = smov 8  }
   0x6   :  { %26 = dma.hbm_to_vmem [thread:$0]  %s19_s17, 256, %s21_s19, [#allocation3], %s259_s23, %s259_s23, %s260_s24  }
   0x7   :  { %s261_s25 = smov [#allocation5]  }
   0x8   :  { %s33_s26 = sshll.u32 %s261_s25, 4  ;;  %s34_s26 = int_to_ptr.vmem [resolvable:$true] %s33_s26 }
   0x9   :  { %39 = dma.hbm_to_vmem [thread:$0]  %s32_s22, 512, %s34_s26, [#allocation6], %s259_s23, %s259_s23, %s260_s24  }
   0xa   :  { %250 = dma.done.wait [#allocation3], 256  }
   0xb   :  { %251 = vsyncadd [#allocation3], 4294967040 }
   0xc   :  { %252 = dma.done.wait [#allocation6], 512  }
   0xd   :  { %253 = vsyncadd [#allocation6], 4294966784  ;;  %v55_v0 = vld [vmem:[#allocation5 + $0x18] sm:$0xff]  ;;  %v54_v1 = vld [vmem:[#allocation5 + $0x10] sm:$0xff]  ;;  %vm60_vm0 = vcmask 261120   ;;  %s262_s27 = smov [#allocation7]  }
   0xe   :  { %79 = vmatpush.msra.mxu0 %v55_v0  ;;  %142 = vmatpush.msra.mxu1 %v55_v0  ;;  %v53_v2 = vld [vmem:[#allocation5 + $0x8] sm:$0xff]  ;;  %v52_v3 = vld [vmem:[#allocation5] sm:$0xff]  ;;  %v50_v4 = vld [vmem:[#allocation2] sm:$0xff]  ;;  %s106_s28 = sshll.u32 %s262_s27, 4  ;;  %s108_s5 = sshll.u32 %s326_s3, 4  ;;  %s107_s28 = int_to_ptr.vmem [resolvable:$true] %s106_s28  ;;  %s109_s5 = int_to_ptr.hbm [resolvable:$true] %s108_s5 }
   0xf   :  { %v51_v5 = vld [vmem:[#allocation2 + $0x8] sm:$0xff]  ;;  %v153_v6 = vld [vmem:[%s325_s2] ss:$0 sm:$0xff]  ;;  %s263_s6 = smov 96   ;;  %s264_s2 = smov [#allocation8]  }
  0x10   :  { %80 = vmatpush.msra.mxu0 %v54_v1  ;;  %143 = vmatpush.msra.mxu1 %v54_v1  ;;  %s119_s3 = sshll.u32 %s264_s2, 4  ;;  %s121_s9 = sshll.u32 %s327_s4, 4  ;;  %s120_s3 = int_to_ptr.vmem [resolvable:$true] %s119_s3  ;;  %s122_s9 = int_to_ptr.hbm [resolvable:$true] %s121_s9 }
  0x12   :  { %81 = vmatpush.msra.mxu0 %v53_v2  ;;  %144 = vmatpush.msra.mxu1 %v53_v2 }
  0x14   :  { %82 = vmatpush.msra.mxu0 %v52_v3  ;;  %145 = vmatpush.msra.mxu1 %v52_v3 }
  0x15   :  { %140 = vmatmul.msk.f32.vlgmr.msra.gmra.mxu0 %vm60_vm0, %v50_v4  ;;  %141 = vmatmul.msk.f32.vlgmr.msra.gmra.mxu1 %vm60_vm0, %v51_v5 }
  0x92   :  { %v84_v7 = vpop.f32.mrf.mxu0  ;;  %v87_v8 = vpop.f32.mrf.mxu1 }
  0x93   :  { %v85_v9 = vadd.f32 %v153_v6, %v84_v7  ;;  %v88_v10 = vadd.f32 %v153_v6, %v87_v8 }
  0x95   :  { %90 = vst.msk [vmem:[#allocation7] sm:$0xff] %vm60_vm0, %v85_v9  ;;  %94 = vrot.lane.b32.xlu0 %v85_v9, %s263_s6 }
  0x96   :  { %91 = vst.msk [vmem:[#allocation7 + $0x8] sm:$0xff] %vm60_vm0, %v88_v10 }
  0x97   :  { %114 = dma.vmem_to_hbm [thread:$0]  %s107_s28, 256, %s109_s5, [#allocation4], %s259_s23, %s259_s23, %s260_s24  }
  0x9d   :  { %96 = vrot.lane.b32.xlu0 %v88_v10, %s263_s6 }
 0x107   :  { %v95_v11 = vpop.permute.xlu0 %94 }
 0x108   :  { %100 = vst.msk [vmem:[#allocation8] sm:$0xff] %vm60_vm0, %v95_v11 }
 0x10f   :  { %v97_v12 = vpop.permute.xlu0 %96 }
 0x110   :  { %101 = vst.msk [vmem:[#allocation8 + $0x8] sm:$0xff] %vm60_vm0, %v97_v12 }
 0x111   :  { %127 = dma.vmem_to_hbm [thread:$0]  %s120_s3, 256, %s122_s9, [#allocation9], %s259_s23, %s259_s23, %s260_s24  }
 0x112   :  { %254 = dma.done.wait [#allocation4], 256  }
 0x113   :  { %255 = vsyncadd [#allocation4], 4294967040 }
 0x114   :  { %256 = dma.done.wait [#allocation9], 256  }
 0x115   :  { %257 = vsyncadd [#allocation9], 4294967040 }
 0x116   :  { %136 = vsyncpa [#allocation3], 1 }
 0x117   :  { %137 = vsyncpa [#allocation6], 1 }
 0x118   :  { %138 = vsyncpa [#allocation4], 1 }
 0x119   :  { %139 = vsyncpa [#allocation9], 1 }

// kernel: tpu_custom_call.1
= control target key start
LH: loop header
LB: loop body
LE: loop exit
PB: predicated region body
PF: predicated region fallthrough
CT: control target
= control target key end

     0   :  { %10 = vsyncpa [#allocation3], 0  ;;  %s323_s0 = inlined_call_operand.hbm [shape: f32[16,32], index: 0, kind: input, shape index: {}]   ;;  %s324_s1 = inlined_call_operand.hbm [shape: f32[32,64], index: 1, kind: input, shape index: {}]   ;;  %s325_s2 = inlined_call_operand.vmem [shape: f32[1,64], index: 2, kind: input, shape index: {}]   ;;  %s326_s3 = inlined_call_operand.hbm [shape: f32[16,32], index: 3, kind: output, shape index: {0}]   ;;  %s327_s4 = inlined_call_operand.hbm [shape: f32[16,32], index: 4, kind: output, shape index: {1}]  }
   0x1   :  { %11 = vsyncpa [#allocation6], 0 }
   0x2   :  { %12 = vsyncpa [#allocation4], 0 }
   0x3   :  { %13 = vsyncpa [#allocation9], 0  ;;  %s18_s17 = sshll.u32 %s323_s0, 4  ;;  %s258_s18 = smov [#allocation2]   ;;  %s19_s17 = int_to_ptr.hbm [resolvable:$true] %s18_s17 }
   0x4   :  { %s20_s19 = sshll.u32 %s258_s18, 4  ;;  %s31_s22 = sshll.u32 %s324_s1, 4  ;;  %s21_s19 = int_to_ptr.vmem [resolvable:$true] %s20_s19  ;;  %s32_s22 = int_to_ptr.hbm [resolvable:$true] %s31_s22 }
   0x5   :  { %s259_s23 = smov 128   ;;  %s260_s24 = smov 8  }
   0x6   :  { %26 = dma.hbm_to_vmem [thread:$0]  %s19_s17, 256, %s21_s19, [#allocation3], %s259_s23, %s259_s23, %s260_s24  }
   0x7   :  { %s261_s25 = smov [#allocation5]  }
   0x8   :  { %s33_s26 = sshll.u32 %s261_s25, 4  ;;  %s34_s26 = int_to_ptr.vmem [resolvable:$true] %s33_s26 }
   0x9   :  { %39 = dma.hbm_to_vmem [thread:$0]  %s32_s22, 512, %s34_s26, [#allocation6], %s259_s23, %s259_s23, %s260_s24  }
   0xa   :  { %250 = dma.done.wait [#allocation3], 256  }
   0xb   :  { %251 = vsyncadd [#allocation3], 4294967040 }
   0xc   :  { %252 = dma.done.wait [#allocation6], 512  }
   0xd   :  { %253 = vsyncadd [#allocation6], 4294966784  ;;  %v55_v0 = vld [vmem:[#allocation5 + $0x18] sm:$0xff]  ;;  %v54_v1 = vld [vmem:[#allocation5 + $0x10] sm:$0xff]  ;;  %vm60_vm0 = vcmask 261120   ;;  %s262_s27 = smov [#allocation7]  }
   0xe   :  { %79 = vmatpush.msra.mxu0 %v55_v0  ;;  %142 = vmatpush.msra.mxu1 %v55_v0  ;;  %v53_v2 = vld [vmem:[#allocation5 + $0x8] sm:$0xff]  ;;  %v52_v3 = vld [vmem:[#allocation5] sm:$0xff]  ;;  %v50_v4 = vld [vmem:[#allocation2] sm:$0xff]  ;;  %s106_s28 = sshll.u32 %s262_s27, 4  ;;  %s108_s5 = sshll.u32 %s326_s3, 4  ;;  %s107_s28 = int_to_ptr.vmem [resolvable:$true] %s106_s28  ;;  %s109_s5 = int_to_ptr.hbm [resolvable:$true] %s108_s5 }
   0xf   :  { %v51_v5 = vld [vmem:[#allocation2 + $0x8] sm:$0xff]  ;;  %v153_v6 = vld [vmem:[%s325_s2] ss:$0 sm:$0xff]  ;;  %s263_s6 = smov 96   ;;  %s264_s2 = smov [#allocation8]  }
  0x10   :  { %80 = vmatpush.msra.mxu0 %v54_v1  ;;  %143 = vmatpush.msra.mxu1 %v54_v1  ;;  %s119_s3 = sshll.u32 %s264_s2, 4  ;;  %s121_s9 = sshll.u32 %s327_s4, 4  ;;  %s120_s3 = int_to_ptr.vmem [resolvable:$true] %s119_s3  ;;  %s122_s9 = int_to_ptr.hbm [resolvable:$true] %s121_s9 }
  0x12   :  { %81 = vmatpush.msra.mxu0 %v53_v2  ;;  %144 = vmatpush.msra.mxu1 %v53_v2 }
  0x14   :  { %82 = vmatpush.msra.mxu0 %v52_v3  ;;  %145 = vmatpush.msra.mxu1 %v52_v3 }
  0x15   :  { %140 = vmatmul.msk.f32.vlgmr.msra.gmra.mxu0 %vm60_vm0, %v50_v4  ;;  %141 = vmatmul.msk.f32.vlgmr.msra.gmra.mxu1 %vm60_vm0, %v51_v5 }
  0x92   :  { %v84_v7 = vpop.f32.mrf.mxu0  ;;  %v87_v8 = vpop.f32.mrf.mxu1 }
  0x93   :  { %v85_v9 = vadd.f32 %v153_v6, %v84_v7  ;;  %v88_v10 = vadd.f32 %v153_v6, %v87_v8 }
  0x95   :  { %90 = vst.msk [vmem:[#allocation7] sm:$0xff] %vm60_vm0, %v85_v9  ;;  %94 = vrot.lane.b32.xlu0 %v85_v9, %s263_s6 }
  0x96   :  { %91 = vst.msk [vmem:[#allocation7 + $0x8] sm:$0xff] %vm60_vm0, %v88_v10 }
  0x97   :  { %114 = dma.vmem_to_hbm [thread:$0]  %s107_s28, 256, %s109_s5, [#allocation4], %s259_s23, %s259_s23, %s260_s24  }
  0x9d   :  { %96 = vrot.lane.b32.xlu0 %v88_v10, %s263_s6 }
 0x107   :  { %v95_v11 = vpop.permute.xlu0 %94 }
 0x108   :  { %100 = vst.msk [vmem:[#allocation8] sm:$0xff] %vm60_vm0, %v95_v11 }
 0x10f   :  { %v97_v12 = vpop.permute.xlu0 %96 }
 0x110   :  { %101 = vst.msk [vmem:[#allocation8 + $0x8] sm:$0xff] %vm60_vm0, %v97_v12 }
 0x111   :  { %127 = dma.vmem_to_hbm [thread:$0]  %s120_s3, 256, %s122_s9, [#allocation9], %s259_s23, %s259_s23, %s260_s24  }
 0x112   :  { %254 = dma.done.wait [#allocation4], 256  }
 0x113   :  { %255 = vsyncadd [#allocation4], 4294967040 }
 0x114   :  { %256 = dma.done.wait [#allocation9], 256  }
 0x115   :  { %257 = vsyncadd [#allocation9], 4294967040 }
 0x116   :  { %136 = vsyncpa [#allocation3], 1 }
 0x117   :  { %137 = vsyncpa [#allocation6], 1 }
 0x118   :  { %138 = vsyncpa [#allocation4], 1 }
 0x119   :  { %139 = vsyncpa [#allocation9], 1 }

</bundles_post_ra>
